<compile_context>
chip_gen: v5e
topology: v5e:2x2
jax: 0.10.0
libtpu: 0.0.40
codegen_flags: <defaults>
</compile_context>

<pallas_src>
import functools

import jax
import jax.numpy as jnp
from jax import lax
from jax.experimental import pallas as pl
from jax.experimental.pallas import tpu as pltpu


def _nc1_kernel(x_ref, labels_ref, means_ref, msq_ref, loss_ref, d_acc, n_acc,
                *, num_classes):
    # x_ref:      (TILE_B, D)   input dtype (f32 or bf16)
    # labels_ref: (TILE_B, 1)   int32 (padding rows carry label -1)
    # means_ref:  (C_pad, D)    input dtype (class-padded with zeros)
    # msq_ref:    (1, C_pad)    f32 per-class ||m_c||^2 (precomputed)
    # loss_ref:   (1, C_pad)    f32 output (scalar loss broadcast across lanes)
    # d_acc:      (1, C_pad)    f32 VMEM accumulator (masked-distance partials)
    # n_acc:      (1, C_pad)    f32 VMEM accumulator (per-class counts)
    i = pl.program_id(0)

    @pl.when(i == 0)
    def _init():
        d_acc[...] = jnp.zeros_like(d_acc)
        n_acc[...] = jnp.zeros_like(n_acc)

    x = x_ref[...]                       # native dtype -> MXU operand
    m = means_ref[...]                   # native dtype -> MXU operand
    labels = labels_ref[...]             # (TILE_B, 1) int32

    tile_b = x.shape[0]
    c_pad = m.shape[0]

    # cross[i, c] = x_i . m_c  -- MXU matmul, contraction over feat_dim,
    # output is lane-dense because C is padded to a multiple of 128.
    cross = lax.dot_general(
        x, m,
        dimension_numbers=(((1,), (1,)), ((), ())),
        preferred_element_type=jnp.float32,
    )                                    # (TILE_B, C_pad) f32

    xf = x.astype(jnp.float32)
    xsq = jnp.sum(xf * xf, axis=1, keepdims=True)          # (TILE_B, 1) f32

    # One-hot class mask (2D iota required on TPU). Padding rows (label == -1)
    # produce all-zero mask rows and contribute nothing.
    classes = lax.broadcasted_iota(jnp.int32, (tile_b, c_pad), 1)
    mask = (labels == classes).astype(jnp.float32)          # (TILE_B, C_pad)

    # Per-class partial sums for this batch tile (||m_c||^2 term added at finalize).
    d_acc[...] += jnp.sum(mask * (xsq - 2.0 * cross), axis=0, keepdims=True)
    n_acc[...] += jnp.sum(mask, axis=0, keepdims=True)

    @pl.when(i == pl.num_programs(0) - 1)
    def _finalize():
        n = n_acc[...]
        d = d_acc[...] + n * msq_ref[...]                   # full sum_i mask*||x_i - m_c||^2
        denom = n + 1e-10
        inv = pl.reciprocal(denom, approx=True)             # EUP seed (free slot)
        inv = inv * (2.0 - denom * inv)                     # Newton step 1
        inv = inv * (2.0 - denom * inv)                     # Newton step 2 (~f32 exact)
        per_class = jnp.clip(d * inv, 1e-12, 1e12)          # clamp the D/N ratio, as in the module
        lane = lax.broadcasted_iota(jnp.int32, per_class.shape, 1)
        per_class = jnp.where(lane < num_classes, per_class, 0.0)  # drop padded classes
        loss = jnp.sum(per_class) / jnp.float32(num_classes)
        loss_ref[...] = jnp.full(loss_ref.shape, loss, dtype=jnp.float32)


def nc1_loss(x, labels, means, *, tile_b=128):
    """Pallas implementation of NC1Loss.forward.

    Args:
      x:      (batch, feat_dim) float array.
      labels: (batch,) integer labels.
      means:  (num_classes, feat_dim) float array (the learnable parameter).

    Returns:
      (loss, means) -- scalar float32 loss and the means parameter
      (pass-through), matching the PyTorch module's return signature.
    """
    x = jnp.asarray(x)
    means = jnp.asarray(means)
    labels = jnp.asarray(labels)

    B, D = x.shape
    C, D2 = means.shape
    assert D == D2, "feat_dim mismatch between x and means"
    assert tile_b % 8 == 0, "tile_b must be a multiple of 8"

    # Pad classes to a lane-dense multiple of 128 and batch to a multiple of tile_b.
    c_pad = ((C + 127) // 128) * 128
    num_tiles = pl.cdiv(B, tile_b)
    b_pad = num_tiles * tile_b

    means_c = means.astype(x.dtype)                         # MXU operands in native dtype
    x_p = jnp.pad(x, ((0, b_pad - B), (0, 0)))
    labels_p = jnp.pad(labels.astype(jnp.int32), (0, b_pad - B),
                       constant_values=-1).reshape(b_pad, 1)
    means_p = jnp.pad(means_c, ((0, c_pad - C), (0, 0)))
    # ||m_c||^2, precomputed once outside the kernel, row-oriented so the
    # in-kernel accumulators stay (1, C_pad) lane-dense with no transposes.
    msq = jnp.sum(means_p.astype(jnp.float32) ** 2, axis=1).reshape(1, c_pad)

    cost = pl.CostEstimate(
        flops=int(2 * b_pad * c_pad * D + 8 * b_pad * c_pad),
        transcendentals=int(c_pad),
        bytes_accessed=int(x_p.size * x_p.dtype.itemsize
                           + means_p.size * means_p.dtype.itemsize
                           + labels_p.size * 4 + msq.size * 4 + c_pad * 4),
    )

    kernel = functools.partial(_nc1_kernel, num_classes=C)

    out = pl.pallas_call(
        kernel,
        out_shape=jax.ShapeDtypeStruct((1, c_pad), jnp.float32),
        grid_spec=pltpu.PrefetchScalarGridSpec(
            num_scalar_prefetch=0,
            grid=(num_tiles,),
            in_specs=[
                pl.BlockSpec((tile_b, D), lambda i: (i, 0)),   # x batch tile (pipelined)
                pl.BlockSpec((tile_b, 1), lambda i: (i, 0)),   # labels batch tile
                pl.BlockSpec((c_pad, D), lambda i: (0, 0)),    # means (VMEM-resident)
                pl.BlockSpec((1, c_pad), lambda i: (0, 0)),    # ||m||^2 row (resident)
            ],
            out_specs=pl.BlockSpec((1, c_pad), lambda i: (0, 0)),
            scratch_shapes=[
                pltpu.VMEM((1, c_pad), jnp.float32),           # per-class distance partials
                pltpu.VMEM((1, c_pad), jnp.float32),           # per-class counts
            ],
        ),
        compiler_params=pltpu.CompilerParams(
            # Batch axis is the reduction axis (accumulators live across it).
            # For very large C, add a leading "parallel" class-tile axis (v7x 2 TCs)
            # and/or raise vmem_limit_bytes instead of keeping means resident.
            dimension_semantics=("arbitrary",),
        ),
        cost_estimate=cost,
    )(x_p, labels_p, means_p, msq)

    return out[0, 0], means


def _reference(x, labels, means):
    # Pure-JAX reference mirroring the PyTorch forward.
    C = means.shape[0]
    distmat = (
        jnp.sum(x**2, axis=1, keepdims=True)
        + jnp.sum(means**2, axis=1, keepdims=True).T
        - 2.0 * x @ means.T
    )
    mask = (labels[:, None] == jnp.arange(C)[None, :]).astype(jnp.float32)
    D = jnp.sum(distmat * mask, axis=0)
    N = jnp.sum(mask, axis=0) + 1e-10
    return jnp.sum(jnp.clip(D / N, 1e-12, 1e12)) / C


if __name__ == "__main__":
    num_classes = 10
    feat_dim = 128

    key = jax.random.PRNGKey(0)
    k_means, k_x, k_lab, k_x2, k_lab2 = jax.random.split(key, 5)

    # Deterministic parameter init (module __init__: torch.randn(num_classes, feat_dim)).
    means = jax.random.normal(k_means, (num_classes, feat_dim), dtype=jnp.float32)

    # Small single-tile case (batch < TILE_B -> one padded batch tile).
    x = jax.random.normal(k_x, (8, feat_dim), dtype=jnp.float32)
    labels = jax.random.randint(k_lab, (8,), 0, num_classes, dtype=jnp.int32)
    loss, means_out = nc1_loss(x, labels, means)
    jax.block_until_ready(loss)
    jax.block_until_ready(means_out)
    ref = _reference(x, labels, means)
    assert jnp.allclose(loss, ref, rtol=1e-3, atol=1e-2), (loss, ref)

    # Multi-tile case exercising the grid accumulation path (3 batch tiles of 128).
    x2 = jax.random.normal(k_x2, (300, feat_dim), dtype=jnp.float32)
    labels2 = jax.random.randint(k_lab2, (300,), 0, num_classes, dtype=jnp.int32)
    loss2, _ = nc1_loss(x2, labels2, means)
    jax.block_until_ready(loss2)
    ref2 = _reference(x2, labels2, means)
    assert jnp.allclose(loss2, ref2, rtol=1e-3, atol=1e-2), (loss2, ref2)

    print("KERNEL_OK")
</pallas_src>

<mosaic_0001>
module attributes {stable_mosaic.version = 11 : i64} {
  func.func @_nc1_kernel(%arg0: i32, %arg1: memref<128x128xf32, #tpu.memory_space<vmem>>, %arg2: memref<128x1xi32, #tpu.memory_space<vmem>>, %arg3: memref<128x128xf32, #tpu.memory_space<vmem>>, %arg4: memref<1x128xf32, #tpu.memory_space<vmem>>, %arg5: memref<1x128xf32, #tpu.memory_space<vmem>>, %arg6: memref<1x128xf32, #tpu.memory_space<vmem>>, %arg7: memref<1x128xf32, #tpu.memory_space<vmem>>) attributes {dimension_semantics = [#tpu.dimension_semantics<arbitrary>], iteration_bounds = array<i64: 1>, scalar_prefetch = 0 : i64, scratch_operands = 2 : i64, tpu.core_type = #tpu.core_type<tc>, window_params = [{transform_indices = @transform_0, window_bounds = array<i64: 128, 128>}, {transform_indices = @transform_1, window_bounds = array<i64: 128, 1>}, {pipeline_mode = #tpu.pipeline_mode<synchronous>, transform_indices = @transform_2, window_bounds = array<i64: 128, 128>}, {pipeline_mode = #tpu.pipeline_mode<synchronous>, transform_indices = @transform_3, window_bounds = array<i64: 1, 128>}, {pipeline_mode = #tpu.pipeline_mode<synchronous>, transform_indices = @transform_4, window_bounds = array<i64: 1, 128>}]} {
    %c0_i32 = arith.constant 0 : i32
    %0 = arith.cmpi eq, %arg0, %c0_i32 : i32
    %1 = arith.extui %0 : i1 to i32
    %c0_i32_0 = arith.constant 0 : i32
    %2 = arith.cmpi ne, %1, %c0_i32_0 : i32
    scf.if %2 {
      %cst_20 = arith.constant 0.000000e+00 : f32
      %33 = vector.broadcast %cst_20 : f32 to vector<1x128xf32>
      %c0_21 = arith.constant 0 : index
      %c0_22 = arith.constant 0 : index
      %34 = vector.load %arg6[%c0_21, %c0_22] : memref<1x128xf32, #tpu.memory_space<vmem>>, vector<1x128xf32>
      tpu.vector_store %arg6[%c0_21, %c0_22], %33 {strides = array<i32>} : memref<1x128xf32, #tpu.memory_space<vmem>>, vector<1x128xf32>,
      %cst_23 = arith.constant 0.000000e+00 : f32
      %35 = vector.broadcast %cst_23 : f32 to vector<1x128xf32>
      %c0_24 = arith.constant 0 : index
      %c0_25 = arith.constant 0 : index
      %36 = vector.load %arg7[%c0_24, %c0_25] : memref<1x128xf32, #tpu.memory_space<vmem>>, vector<1x128xf32>
      tpu.vector_store %arg7[%c0_24, %c0_25], %35 {strides = array<i32>} : memref<1x128xf32, #tpu.memory_space<vmem>>, vector<1x128xf32>,
    } else {
    }
    %c0 = arith.constant 0 : index
    %c0_1 = arith.constant 0 : index
    %3 = vector.load %arg1[%c0, %c0_1] : memref<128x128xf32, #tpu.memory_space<vmem>>, vector<128x128xf32>
    %c0_2 = arith.constant 0 : index
    %c0_3 = arith.constant 0 : index
    %4 = vector.load %arg3[%c0_2, %c0_3] : memref<128x128xf32, #tpu.memory_space<vmem>>, vector<128x128xf32>
    %c0_4 = arith.constant 0 : index
    %c0_5 = arith.constant 0 : index
    %5 = vector.load %arg2[%c0_4, %c0_5] : memref<128x1xi32, #tpu.memory_space<vmem>>, vector<128x1xi32>
    %cst = arith.constant dense<0.000000e+00> : vector<128x128xf32>
    %6 = tpu.matmul %3, %4, %cst {dimension_numbers = #tpu.dot_dimension_numbers<[1], [1], [0], [0], [0, 0, 1, 0], [], []>} : vector<128x128xf32>, vector<128x128xf32>, vector<128x128xf32> -> vector<128x128xf32>
    %7 = arith.mulf %3, %3 : vector<128x128xf32>
    %cst_6 = arith.constant dense<0.000000e+00> : vector<128xf32>
    %8 = vector.multi_reduction <add>, %7, %cst_6 [1] : vector<128x128xf32> to vector<128xf32>
    %9 = vector.shape_cast %8 : vector<128xf32> to vector<128x1xf32>
    %10 = tpu.iota {dimensions = array<i32: 1>} : vector<128x128xi32>
    %11 = vector.broadcast %5 : vector<128x1xi32> to vector<128x128xi32>
    %12 = arith.cmpi eq, %11, %10 : vector<128x128xi32>
    %13 = arith.extui %12 : vector<128x128xi1> to vector<128x128xi32>
    %14 = arith.sitofp %13 : vector<128x128xi32> to vector<128x128xf32>
    %c0_7 = arith.constant 0 : index
    %c0_8 = arith.constant 0 : index
    %15 = vector.load %arg6[%c0_7, %c0_8] : memref<1x128xf32, #tpu.memory_space<vmem>>, vector<1x128xf32>
    %cst_9 = arith.constant 2.000000e+00 : f32
    %16 = vector.broadcast %cst_9 : f32 to vector<128x128xf32>
    %17 = arith.mulf %16, %6 : vector<128x128xf32>
    %18 = vector.broadcast %9 : vector<128x1xf32> to vector<128x128xf32>
    %19 = arith.subf %18, %17 : vector<128x128xf32>
    %20 = arith.mulf %14, %19 : vector<128x128xf32>
    %cst_10 = arith.constant dense<0.000000e+00> : vector<128xf32>
    %21 = vector.multi_reduction <add>, %20, %cst_10 [0] : vector<128x128xf32> to vector<128xf32>
    %22 = vector.shape_cast %21 : vector<128xf32> to vector<1x128xf32>
    %23 = arith.addf %15, %22 : vector<1x128xf32>
    %c0_11 = arith.constant 0 : index
    %c0_12 = arith.constant 0 : index
    %24 = vector.load %arg6[%c0_11, %c0_12] : memref<1x128xf32, #tpu.memory_space<vmem>>, vector<1x128xf32>
    tpu.vector_store %arg6[%c0_11, %c0_12], %23 {strides = array<i32>} : memref<1x128xf32, #tpu.memory_space<vmem>>, vector<1x128xf32>,
    %c0_13 = arith.constant 0 : index
    %c0_14 = arith.constant 0 : index
    %25 = vector.load %arg7[%c0_13, %c0_14] : memref<1x128xf32, #tpu.memory_space<vmem>>, vector<1x128xf32>
    %cst_15 = arith.constant dense<0.000000e+00> : vector<128xf32>
    %26 = vector.multi_reduction <add>, %14, %cst_15 [0] : vector<128x128xf32> to vector<128xf32>
    %27 = vector.shape_cast %26 : vector<128xf32> to vector<1x128xf32>
    %28 = arith.addf %25, %27 : vector<1x128xf32>
    %c0_16 = arith.constant 0 : index
    %c0_17 = arith.constant 0 : index
    %29 = vector.load %arg7[%c0_16, %c0_17] : memref<1x128xf32, #tpu.memory_space<vmem>>, vector<1x128xf32>
    tpu.vector_store %arg7[%c0_16, %c0_17], %28 {strides = array<i32>} : memref<1x128xf32, #tpu.memory_space<vmem>>, vector<1x128xf32>,
    %c0_i32_18 = arith.constant 0 : i32
    %30 = arith.cmpi eq, %arg0, %c0_i32_18 : i32
    %31 = arith.extui %30 : i1 to i32
    %c0_i32_19 = arith.constant 0 : i32
    %32 = arith.cmpi ne, %31, %c0_i32_19 : i32
    scf.if %32 {
      %c0_20 = arith.constant 0 : index
      %c0_21 = arith.constant 0 : index
      %33 = vector.load %arg7[%c0_20, %c0_21] : memref<1x128xf32, #tpu.memory_space<vmem>>, vector<1x128xf32>
      %c0_22 = arith.constant 0 : index
      %c0_23 = arith.constant 0 : index
      %34 = vector.load %arg6[%c0_22, %c0_23] : memref<1x128xf32, #tpu.memory_space<vmem>>, vector<1x128xf32>
      %c0_24 = arith.constant 0 : index
      %c0_25 = arith.constant 0 : index
      %35 = vector.load %arg4[%c0_24, %c0_25] : memref<1x128xf32, #tpu.memory_space<vmem>>, vector<1x128xf32>
      %36 = arith.mulf %33, %35 : vector<1x128xf32>
      %37 = arith.addf %34, %36 : vector<1x128xf32>
      %cst_26 = arith.constant 1.000000e-10 : f32
      %38 = vector.broadcast %cst_26 : f32 to vector<1x128xf32>
      %39 = arith.addf %33, %38 : vector<1x128xf32>
      %40 = tpu.reciprocal %39 {approx = true} : vector<1x128xf32> -> vector<1x128xf32>
      %41 = arith.mulf %39, %40 : vector<1x128xf32>
      %cst_27 = arith.constant 2.000000e+00 : f32
      %42 = vector.broadcast %cst_27 : f32 to vector<1x128xf32>
      %43 = arith.subf %42, %41 : vector<1x128xf32>
      %44 = arith.mulf %40, %43 : vector<1x128xf32>
      %45 = arith.mulf %39, %44 : vector<1x128xf32>
      %cst_28 = arith.constant 2.000000e+00 : f32
      %46 = vector.broadcast %cst_28 : f32 to vector<1x128xf32>
      %47 = arith.subf %46, %45 : vector<1x128xf32>
      %48 = arith.mulf %44, %47 : vector<1x128xf32>
      %49 = arith.mulf %37, %48 : vector<1x128xf32>
      %cst_29 = arith.constant 9.99999996E-13 : f32
      %cst_30 = arith.constant 9.99999995E+11 : f32
      %50 = vector.broadcast %cst_29 : f32 to vector<1x128xf32>
      %51 = arith.maximumf %50, %49 : vector<1x128xf32>
      %52 = vector.broadcast %cst_30 : f32 to vector<1x128xf32>
      %53 = arith.minimumf %52, %51 : vector<1x128xf32>
      %54 = tpu.iota {dimensions = array<i32: 1>} : vector<1x128xi32>
      %c10_i32 = arith.constant 10 : i32
      %55 = vector.broadcast %c10_i32 : i32 to vector<1x128xi32>
      %56 = arith.cmpi slt, %54, %55 : vector<1x128xi32>
      %cst_31 = arith.constant 0.000000e+00 : f32
      %57 = vector.broadcast %cst_31 : f32 to vector<1x128xf32>
      %58 = arith.select %56, %53, %57 : vector<1x128xi1>, vector<1x128xf32>
      %59 = vector.shape_cast %58 : vector<1x128xf32> to vector<1x1x128xf32>
      %cst_32 = arith.constant dense<0.000000e+00> : vector<1xf32>
      %60 = vector.multi_reduction <add>, %59, %cst_32 [1, 2] : vector<1x1x128xf32> to vector<1xf32>
      %61 = vector.shape_cast %60 : vector<1xf32> to vector<1x1x1xf32>
      %62 = vector.extract %61[0, 0, 0] : f32 from vector<1x1x1xf32>
      %cst_33 = arith.constant 1.000000e+01 : f32
      %63 = arith.divf %62, %cst_33 : f32
      %64 = vector.broadcast %63 : f32 to vector<1x128xf32>
      %c0_34 = arith.constant 0 : index
      %c0_35 = arith.constant 0 : index
      %65 = vector.load %arg5[%c0_34, %c0_35] : memref<1x128xf32, #tpu.memory_space<vmem>>, vector<1x128xf32>
      tpu.vector_store %arg5[%c0_34, %c0_35], %64 {strides = array<i32>} : memref<1x128xf32, #tpu.memory_space<vmem>>, vector<1x128xf32>,
    } else {
    }
    return
  }
  func.func @transform_0(%arg0: i32) -> (i32, i32) {
    %c0_i32 = arith.constant 0 : i32
    %c0_i32_0 = arith.constant 0 : i32
    return %arg0, %c0_i32 : i32, i32
  }
  func.func @transform_1(%arg0: i32) -> (i32, i32) {
    %c0_i32 = arith.constant 0 : i32
    %c0_i32_0 = arith.constant 0 : i32
    return %arg0, %c0_i32 : i32, i32
  }
  func.func @transform_2(%arg0: i32) -> (i32, i32) {
    %c0_i32 = arith.constant 0 : i32
    %c0_i32_0 = arith.constant 0 : i32
    %c0_i32_1 = arith.constant 0 : i32
    return %c0_i32, %c0_i32_0 : i32, i32
  }
  func.func @transform_3(%arg0: i32) -> (i32, i32) {
    %c0_i32 = arith.constant 0 : i32
    %c0_i32_0 = arith.constant 0 : i32
    %c0_i32_1 = arith.constant 0 : i32
    return %c0_i32, %c0_i32_0 : i32, i32
  }
  func.func @transform_4(%arg0: i32) -> (i32, i32) {
    %c0_i32 = arith.constant 0 : i32
    %c0_i32_0 = arith.constant 0 : i32
    %c0_i32_1 = arith.constant 0 : i32
    return %c0_i32, %c0_i32_0 : i32, i32
  }
}

</mosaic_0001>

<bundles_post_ra>
// kernel: tpu_custom_call.1
= control target key start
LH: loop header
LB: loop body
LE: loop exit
PB: predicated region body
PF: predicated region fallthrough
CT: control target
= control target key end

     0   :  { %9 = vsyncpa [#allocation5], 0  ;;  %s867_s0 = inlined_call_operand.vmem [shape: f32[128,128], index: 0, kind: input, shape index: {}]   ;;  %s868_s1 = inlined_call_operand.vmem [shape: s32[128,1], index: 1, kind: input, shape index: {}]   ;;  %s869_s2 = inlined_call_operand.hbm [shape: f32[128,128], index: 2, kind: input, shape index: {}]   ;;  %s870_s3 = inlined_call_operand.vmem [shape: f32[1,128], index: 3, kind: input, shape index: {}]   ;;  %s871_s4 = inlined_call_operand.hbm [shape: f32[1,128], index: 4, kind: output, shape index: {}]  }
   0x1   :  { %10 = vsyncpa [#allocation6], 0  ;;  %s19_s17 = sshll.u32 %s869_s2, 4  ;;  %s589_s18 = smov [#allocation4]   ;;  %s20_s17 = int_to_ptr.hbm [resolvable:$true] %s19_s17 }
   0x2   :  { %s21_s19 = sshll.u32 %s589_s18, 4  ;;  %s590_s20 = smov 128   ;;  %s22_s19 = int_to_ptr.vmem [resolvable:$true] %s21_s19 }
   0x3   :  { %s591_s21 = smov 8  }
   0x4   :  { %27 = dma.hbm_to_vmem [thread:$0]  %s20_s17, 2048, %s22_s19, [#allocation5], %s590_s20, %s590_s20, %s591_s21  }
   0x5   :  { %585 = dma.done.wait [#allocation5], 2048  }
   0x6   :  { %586 = vsyncadd [#allocation5], 4294965248  ;;  %v592_v0 = vmov 0   ;;  %v71_v1 = vld [vmem:[#allocation4 + $0x78] sm:$0xff]  ;;  %v627_v2 = vld [vmem:[%s867_s0 + $0x10] sm:$0xff]  ;;  %v593_v55 = vmov 0.0  }
   0x7   :  { %530 = vset.pattern.permute.xlu2 %v592_v0  ;;  %532 = vset.pattern.permute.xlu0 %v592_v0  ;;  %v632_v3 = vld [vmem:[%s867_s0 + $0x8] sm:$0xff]  ;;  %v155_v4 = vmul.f32 %v627_v2, %v627_v2  ;;  %v641_v6 = vld [vmem:[%s867_s0] sm:$0xff]  ;;  %v70_v8 = vld [vmem:[#allocation4 + $0x70] sm:$0xff]  ;;  %38 = vst [vmem:[#allocation2] sm:$0x1] %v593_v55  ;;  %s445_s9 = sshll.u32 %s871_s4, 4  ;;  %s446_s9 = int_to_ptr.hbm [resolvable:$true] %s445_s9 }
   0x8   :  { %531 = vset.pattern.permute.xlu1 %v592_v0  ;;  %88 = vmatpush.xpose.msra.mxu0 %v71_v1  ;;  %v154_v5 = vmul.f32 %v632_v3, %v632_v3  ;;  %v153_v7 = vmul.f32 %v641_v6, %v641_v6  ;;  %v648_v9 = vld [vmem:[%s867_s0 + $0x18] sm:$0xff]  ;;  %v653_v10 = vld [vmem:[%s867_s0 + $0x28] sm:$0xff]  ;;  %v662_v15 = vld [vmem:[%s867_s0 + $0x20] sm:$0xff]  ;;  %39 = vst [vmem:[#allocation3] sm:$0x1] %v593_v55 }
   0x9   :  { %471 = vmatpush.xpose.msra.mxu1 %v71_v1  ;;  %472 = vmatpush.xpose.msra.mxu2 %v71_v1  ;;  %v69_v11 = vld [vmem:[#allocation4 + $0x68] sm:$0xff]  ;;  %v156_v12 = vmul.f32 %v648_v9, %v648_v9  ;;  %v158_v13 = vmul.f32 %v653_v10, %v653_v10  ;;  %v68_v14 = vld [vmem:[#allocation4 + $0x60] sm:$0xff]  ;;  %v67_v16 = vld [vmem:[#allocation4 + $0x58] sm:$0xff]  ;;  %v157_v17 = vmul.f32 %v662_v15, %v662_v15 }
   0xa   :  { %473 = vmatpush.xpose.msra.mxu3 %v71_v1  ;;  %173 = vadd.xlane.f32.xlu2 %v155_v4  ;;  %v66_v18 = vld [vmem:[#allocation4 + $0x50] sm:$0xff]  ;;  %v65_v19 = vld [vmem:[#allocation4 + $0x48] sm:$0xff]  ;;  %v76_v20 = vld [vmem:[%s868_s1 + $0x20] sm:$0xff] }
   0xb   :  { %171 = vadd.xlane.f32.xlu1 %v154_v5  ;;  %169 = vadd.xlane.f32.xlu0 %v153_v7  ;;  %v64_v21 = vld [vmem:[#allocation4 + $0x40] sm:$0xff]  ;;  %v63_v23 = vld [vmem:[#allocation4 + $0x38] sm:$0xff]  ;;  %v62_v25 = vld [vmem:[#allocation4 + $0x30] sm:$0xff] }
   0xc   :  { %89 = vmatpush.xpose.msra.mxu0 %v70_v8  ;;  %v72_v22 = vld [vmem:[%s868_s1] sm:$0xff]  ;;  %v77_v24 = vld [vmem:[%s868_s1 + $0x28] sm:$0xff]  ;;  %v74_v29 = vld [vmem:[%s868_s1 + $0x10] sm:$0xff] }
   0xd   :  { %474 = vmatpush.xpose.msra.mxu1 %v70_v8  ;;  %475 = vmatpush.xpose.msra.mxu2 %v70_v8  ;;  %v73_v26 = vld [vmem:[%s868_s1 + $0x8] sm:$0xff]  ;;  %v80_v28 = vld [vmem:[%s868_s1 + $0x40] sm:$0xff]  ;;  %v78_v31 = vld [vmem:[%s868_s1 + $0x30] sm:$0xff] }
   0xe   :  { %476 = vmatpush.xpose.msra.mxu3 %v70_v8  ;;  %v61_v27 = vld [vmem:[#allocation4 + $0x28] sm:$0xff]  ;;  %v60_v30 = vld [vmem:[#allocation4 + $0x20] sm:$0xff]  ;;  %v59_v32 = vld [vmem:[#allocation4 + $0x18] sm:$0xff] }
   0xf   :  { %v81_v33 = vld [vmem:[%s868_s1 + $0x48] sm:$0xff]  ;;  %v75_v34 = vld [vmem:[%s868_s1 + $0x18] sm:$0xff]  ;;  %v82_v36 = vld [vmem:[%s868_s1 + $0x50] sm:$0xff] }
  0x10   :  { %90 = vmatpush.xpose.msra.mxu0 %v69_v11  ;;  %v58_v35 = vld [vmem:[#allocation4 + $0x10] sm:$0xff]  ;;  %v57_v37 = vld [vmem:[#allocation4 + $0x8] sm:$0xff]  ;;  %v56_v40 = vld [vmem:[#allocation4] sm:$0xff] }
  0x11   :  { %477 = vmatpush.xpose.msra.mxu1 %v69_v11  ;;  %478 = vmatpush.xpose.msra.mxu2 %v69_v11  ;;  %v83_v38 = vld [vmem:[%s868_s1 + $0x58] sm:$0xff]  ;;  %v48_v42 = vld [vmem:[%s867_s0 + $0x40] sm:$0xff]  ;;  %v85_v44 = vld [vmem:[%s868_s1 + $0x68] sm:$0xff] }
  0x12   :  { %479 = vmatpush.xpose.msra.mxu3 %v69_v11  ;;  %v79_v39 = vld [vmem:[%s868_s1 + $0x38] sm:$0xff]  ;;  %v52_v43 = vld [vmem:[%s867_s0 + $0x60] sm:$0xff]  ;;  %v49_v46 = vld [vmem:[%s867_s0 + $0x48] sm:$0xff]  ;;  %v161_v58 = vmul.f32 %v48_v42, %v48_v42  ;;  %v201_v11 = vlaneseq }
  0x13   :  { %175 = vadd.xlane.f32.xlu1 %v156_v12  ;;  %179 = vadd.xlane.f32.xlu0 %v158_v13  ;;  %v87_v41 = vld [vmem:[%s868_s1 + $0x78] sm:$0xff]  ;;  %v84_v45 = vld [vmem:[%s868_s1 + $0x60] sm:$0xff]  ;;  %v86_v47 = vld [vmem:[%s868_s1 + $0x70] sm:$0xff]  ;;  %v162_v56 = vmul.f32 %v49_v46, %v49_v46  ;;  %v165_v0 = vmul.f32 %v52_v43, %v52_v43 }
  0x14   :  { %91 = vmatpush.xpose.msra.mxu0 %v68_v14  ;;  %v53_v48 = vld [vmem:[%s867_s0 + $0x68] sm:$0xff]  ;;  %v46_v49 = vld [vmem:[%s867_s0 + $0x30] sm:$0xff]  ;;  %v47_v52 = vld [vmem:[%s867_s0 + $0x38] sm:$0xff]  ;;  %v764_v13 = vand.u32 127, %v201_v11 }
  0x15   :  { %480 = vmatpush.xpose.msra.mxu1 %v68_v14  ;;  %481 = vmatpush.xpose.msra.mxu2 %v68_v14  ;;  %v50_v50 = vld [vmem:[%s867_s0 + $0x50] sm:$0xff]  ;;  %v51_v53 = vld [vmem:[%s867_s0 + $0x58] sm:$0xff]  ;;  %v159_v57 = vmul.f32 %v46_v49, %v46_v49  ;;  %v160_v59 = vmul.f32 %v47_v52, %v47_v52 }
  0x16   :  { %482 = vmatpush.xpose.msra.mxu3 %v68_v14  ;;  %v54_v51 = vld [vmem:[%s867_s0 + $0x70] sm:$0xff]  ;;  %v55_v54 = vld [vmem:[%s867_s0 + $0x78] sm:$0xff]  ;;  %v163_v60 = vmul.f32 %v50_v50, %v50_v50  ;;  %v164_v61 = vmul.f32 %v51_v53, %v51_v53 }
  0x17   :  { %v167_v5 = vmul.f32 %v54_v51, %v54_v51 }
  0x18   :  { %92 = vmatpush.xpose.msra.mxu0 %v67_v16 }
  0x19   :  { %483 = vmatpush.xpose.msra.mxu1 %v67_v16  ;;  %484 = vmatpush.xpose.msra.mxu2 %v67_v16 }
  0x1a   :  { %485 = vmatpush.xpose.msra.mxu3 %v67_v16 }
  0x1b   :  { %177 = vadd.xlane.f32.xlu1 %v157_v17 }
  0x1c   :  { %93 = vmatpush.xpose.msra.mxu0 %v66_v18 }
  0x1d   :  { %486 = vmatpush.xpose.msra.mxu1 %v66_v18  ;;  %487 = vmatpush.xpose.msra.mxu2 %v66_v18 }
  0x1e   :  { %488 = vmatpush.xpose.msra.mxu3 %v66_v18 }
  0x20   :  { %94 = vmatpush.xpose.msra.mxu0 %v65_v19 }
  0x21   :  { %489 = vmatpush.xpose.msra.mxu1 %v65_v19  ;;  %490 = vmatpush.xpose.msra.mxu2 %v65_v19 }
  0x22   :  { %491 = vmatpush.xpose.msra.mxu3 %v65_v19  ;;  %216 = vperm.xlu2 %530, %v76_v20  }
  0x24   :  { %95 = vmatpush.xpose.msra.mxu0 %v64_v21 }
  0x25   :  { %492 = vmatpush.xpose.msra.mxu1 %v64_v21  ;;  %493 = vmatpush.xpose.msra.mxu2 %v64_v21 }
  0x26   :  { %494 = vmatpush.xpose.msra.mxu3 %v64_v21 }
  0x27   :  { %204 = vperm.xlu0 %532, %v72_v22  }
  0x28   :  { %96 = vmatpush.xpose.msra.mxu0 %v63_v23 }
  0x29   :  { %495 = vmatpush.xpose.msra.mxu1 %v63_v23  ;;  %496 = vmatpush.xpose.msra.mxu2 %v63_v23 }
  0x2a   :  { %497 = vmatpush.xpose.msra.mxu3 %v63_v23  ;;  %219 = vperm.xlu2 %530, %v77_v24  }
  0x2c   :  { %97 = vmatpush.xpose.msra.mxu0 %v62_v25 }
  0x2d   :  { %498 = vmatpush.xpose.msra.mxu1 %v62_v25  ;;  %499 = vmatpush.xpose.msra.mxu2 %v62_v25 }
  0x2e   :  { %500 = vmatpush.xpose.msra.mxu3 %v62_v25 }
  0x2f   :  { %207 = vperm.xlu0 %532, %v73_v26  }
  0x30   :  { %98 = vmatpush.xpose.msra.mxu0 %v61_v27 }
  0x31   :  { %501 = vmatpush.xpose.msra.mxu1 %v61_v27  ;;  %502 = vmatpush.xpose.msra.mxu2 %v61_v27 }
  0x32   :  { %503 = vmatpush.xpose.msra.mxu3 %v61_v27  ;;  %228 = vperm.xlu2 %530, %v80_v28  }
  0x34   :  { %210 = vperm.xlu1 %531, %v74_v29   ;;  %99 = vmatpush.xpose.msra.mxu0 %v60_v30 }
  0x35   :  { %504 = vmatpush.xpose.msra.mxu1 %v60_v30  ;;  %505 = vmatpush.xpose.msra.mxu2 %v60_v30 }
  0x36   :  { %506 = vmatpush.xpose.msra.mxu3 %v60_v30 }
  0x37   :  { %222 = vperm.xlu0 %532, %v78_v31  }
  0x38   :  { %100 = vmatpush.xpose.msra.mxu0 %v59_v32 }
  0x39   :  { %507 = vmatpush.xpose.msra.mxu1 %v59_v32  ;;  %508 = vmatpush.xpose.msra.mxu2 %v59_v32 }
  0x3a   :  { %509 = vmatpush.xpose.msra.mxu3 %v59_v32  ;;  %231 = vperm.xlu2 %530, %v81_v33  }
  0x3c   :  { %213 = vperm.xlu1 %531, %v75_v34   ;;  %101 = vmatpush.xpose.msra.mxu0 %v58_v35 }
  0x3d   :  { %510 = vmatpush.xpose.msra.mxu1 %v58_v35  ;;  %511 = vmatpush.xpose.msra.mxu2 %v58_v35 }
  0x3e   :  { %512 = vmatpush.xpose.msra.mxu3 %v58_v35 }
  0x3f   :  { %234 = vperm.xlu0 %532, %v82_v36  }
  0x40   :  { %102 = vmatpush.xpose.msra.mxu0 %v57_v37 }
  0x41   :  { %513 = vmatpush.xpose.msra.mxu1 %v57_v37  ;;  %514 = vmatpush.xpose.msra.mxu2 %v57_v37 }
  0x42   :  { %515 = vmatpush.xpose.msra.mxu3 %v57_v37  ;;  %237 = vperm.xlu2 %530, %v83_v38  }
  0x44   :  { %225 = vperm.xlu1 %531, %v79_v39   ;;  %103 = vmatpush.xpose.msra.mxu0 %v56_v40 }
  0x45   :  { %516 = vmatpush.xpose.msra.mxu1 %v56_v40  ;;  %517 = vmatpush.xpose.msra.mxu2 %v56_v40 }
  0x46   :  { %518 = vmatpush.xpose.msra.mxu3 %v56_v40 }
  0x47   :  { %249 = vperm.xlu0 %532, %v87_v41   ;;  %104 = vmatmul.f32.vlgmr.msra.gmra.mxu0 %v641_v6  ;;  %v168_v6 = vmul.f32 %v55_v54, %v55_v54 }
  0x48   :  { %116 = vmatmul.f32.vlgmr.msra.gmra.mxu1 %v662_v15  ;;  %128 = vmatmul.f32.vlgmr.msra.gmra.mxu2 %v48_v42 }
  0x49   :  { %140 = vmatmul.f32.vlgmr.msra.gmra.mxu3 %v52_v43 }
  0x4a   :  { %243 = vperm.xlu2 %530, %v85_v44  }
  0x4c   :  { %240 = vperm.xlu1 %531, %v84_v45  }
  0x4f   :  { %107 = vmatmul.f32.gmra.mxu0 %v632_v3 }
  0x50   :  { %119 = vmatmul.f32.gmra.mxu1 %v653_v10  ;;  %131 = vmatmul.f32.gmra.mxu2 %v49_v46 }
  0x51   :  { %143 = vmatmul.f32.gmra.mxu3 %v53_v48 }
  0x54   :  { %246 = vperm.xlu1 %531, %v86_v47  }
  0x57   :  { %110 = vmatmul.f32.gmra.mxu0 %v627_v2  ;;  %v166_v2 = vmul.f32 %v53_v48, %v53_v48 }
  0x58   :  { %122 = vmatmul.f32.gmra.mxu1 %v46_v49  ;;  %134 = vmatmul.f32.gmra.mxu2 %v50_v50 }
  0x59   :  { %146 = vmatmul.f32.gmra.mxu3 %v54_v51 }
  0x5f   :  { %113 = vmatmul.f32.gmra.mxu0 %v648_v9 }
  0x60   :  { %125 = vmatmul.f32.gmra.mxu1 %v47_v52  ;;  %137 = vmatmul.f32.gmra.mxu2 %v51_v53 }
  0x61   :  { %149 = vmatmul.f32.gmra.mxu3 %v55_v54 }
  0x71   :  { %187 = vadd.xlane.f32.xlu0 %v162_v56 }
  0x73   :  { %181 = vadd.xlane.f32.xlu2 %v159_v57 }
  0x7b   :  { %185 = vadd.xlane.f32.xlu2 %v161_v58 }
  0x7d   :  { %v752_v62 = vpop.xlane.xlu2 %173 }
  0x7e   :  { %183 = vadd.xlane.f32.xlu1 %v160_v59  ;;  %v754_v63 = vpop.xlane.xlu0 %169  ;;  %v756_v1 = vpop.xlane.xlu1 %171 }
  0x83   :  { %189 = vadd.xlane.f32.xlu2 %v163_v60 }
  0x85   :  { %v217_v3 = vpop.permute.xlu2 %216 }
  0x86   :  { %191 = vadd.xlane.f32.xlu1 %v164_v61  ;;  %v758_v4 = vpop.xlane.xlu0 %179  ;;  %v760_v7 = vpop.xlane.xlu1 %175  ;;  %vm255_vm3 = vcmp.eq.s32.totalorder %v217_v3, %v764_v13 }
  0x87   :  { %v459_v26 = vsel %vm255_vm3, 1.0, %v593_v55 }
  0x8b   :  { %193 = vadd.xlane.f32.xlu2 %v165_v0 }
  0x8d   :  { %v220_v8 = vpop.permute.xlu2 %219 }
  0x8e   :  { %195 = vadd.xlane.f32.xlu1 %v166_v2  ;;  %v762_v10 = vpop.xlane.xlu1 %177  ;;  %vm256_vm5 = vcmp.eq.s32.totalorder %v220_v8, %v764_v13 }
  0x8f   :  { %v460_v28 = vsel %vm256_vm5, 1.0, %v593_v55 }
  0x93   :  { %197 = vadd.xlane.f32.xlu2 %v167_v5 }
  0x95   :  { %v229_v12 = vpop.permute.xlu2 %228 }
  0x96   :  { %199 = vadd.xlane.f32.xlu1 %v168_v6  ;;  %vm259_vm7 = vcmp.eq.s32.totalorder %v229_v12, %v764_v13 }
  0x97   :  { %v803_v37 = vsel %vm259_vm7, 1.0, %v593_v55 }
  0x99   :  { %v205_v9 = vpop.permute.xlu0 %204 }
  0x9a   :  { %vm251_vm0 = vcmp.eq.s32.totalorder %v205_v9, %v764_v13 }
  0x9b   :  { %v769_v16 = vsel %vm251_vm0, 1.0, %v593_v55  ;;  %vm414_vm0 = vcmp.lt.s32.totalorder %v764_v13, 10 }
  0x9d   :  { %v232_v19 = vpop.permute.xlu2 %231 }
  0x9e   :  { %vm260_vm9 = vcmp.eq.s32.totalorder %v232_v19, %v764_v13 }
  0x9f   :  { %v808_v39 = vsel %vm260_vm9, 1.0, %v593_v55 }
  0xa1   :  { %v208_v14 = vpop.permute.xlu0 %207 }
  0xa2   :  { %vm252_vm1 = vcmp.eq.s32.totalorder %v208_v14, %v764_v13 }
  0xa3   :  { %v772_v17 = vsel %vm252_vm1, 1.0, %v593_v55  ;;  %vm416_vm1 = vcmask 1040384  }
  0xa4   :  { %v372_v18 = vadd.f32 %v772_v17, %v769_v16 }
  0xa5   :  { %v238_v30 = vpop.permute.xlu2 %237 }
  0xa6   :  { %v211_v15 = vpop.permute.xlu1 %210  ;;  %vm262_vm11 = vcmp.eq.s32.totalorder %v238_v30, %v764_v13 }
  0xa7   :  { %vm253_vm2 = vcmp.eq.s32.totalorder %v211_v15, %v764_v13  ;;  %v818_v44 = vsel %vm262_vm11, 1.0, %v593_v55 }
  0xa8   :  { %v778_v20 = vsel %vm253_vm2, 1.0, %v593_v55 }
  0xa9   :  { %v223_v21 = vpop.permute.xlu0 %222  ;;  %v373_v23 = vadd.f32 %v778_v20, %v372_v18 }
  0xaa   :  { %vm257_vm6 = vcmp.eq.s32.totalorder %v223_v21, %v764_v13 }
  0xab   :  { %v792_v31 = vsel %vm257_vm6, 1.0, %v593_v55 }
  0xad   :  { %v244_v45 = vpop.permute.xlu2 %243 }
  0xae   :  { %v214_v22 = vpop.permute.xlu1 %213  ;;  %vm264_vm13 = vcmp.eq.s32.totalorder %v244_v45, %v764_v13 }
  0xaf   :  { %vm254_vm4 = vcmp.eq.s32.totalorder %v214_v22, %v764_v13  ;;  %v827_v51 = vsel %vm264_vm13, 1.0, %v593_v55 }
  0xb0   :  { %v784_v24 = vsel %vm254_vm4, 1.0, %v593_v55 }
  0xb1   :  { %v374_v25 = vadd.f32 %v784_v24, %v373_v23  ;;  %v235_v34 = vpop.permute.xlu0 %234 }
  0xb2   :  { %vm261_vm10 = vcmp.eq.s32.totalorder %v235_v34, %v764_v13 }
  0xb3   :  { %v375_v27 = vadd.f32 %v459_v26, %v374_v25  ;;  %v813_v41 = vsel %vm261_vm10, 1.0, %v593_v55 }
  0xb5   :  { %v376_v29 = vadd.f32 %v460_v28, %v375_v27 }
  0xb6   :  { %v226_v32 = vpop.permute.xlu1 %225 }
  0xb7   :  { %vm258_vm8 = vcmp.eq.s32.totalorder %v226_v32, %v764_v13  ;;  %v377_v33 = vadd.f32 %v792_v31, %v376_v29 }
  0xb8   :  { %v798_v35 = vsel %vm258_vm8, 1.0, %v593_v55 }
  0xb9   :  { %v378_v36 = vadd.f32 %v798_v35, %v377_v33  ;;  %v250_v49 = vpop.permute.xlu0 %249 }
  0xba   :  { %vm266_vm14 = vcmp.eq.s32.totalorder %v250_v49, %v764_v13 }
  0xbb   :  { %v379_v38 = vadd.f32 %v803_v37, %v378_v36  ;;  %v838_v60 = vsel %vm266_vm14, 1.0, %v593_v55 }
  0xbd   :  { %v380_v40 = vadd.f32 %v808_v39, %v379_v38 }
  0xbe   :  { %v241_v42 = vpop.permute.xlu1 %240 }
  0xbf   :  { %vm263_vm12 = vcmp.eq.s32.totalorder %v241_v42, %v764_v13  ;;  %v381_v43 = vadd.f32 %v813_v41, %v380_v40 }
  0xc0   :  { %v822_v47 = vsel %vm263_vm12, 1.0, %v593_v55 }
  0xc1   :  { %v382_v46 = vadd.f32 %v818_v44, %v381_v43 }
  0xc3   :  { %v383_v48 = vadd.f32 %v822_v47, %v382_v46 }
  0xc4   :  { %v105_v50 = vpop.f32.mrf.mxu0 }
  0xc5   :  { %v117_v52 = vpop.f32.mrf.mxu1  ;;  %v384_v56 = vadd.f32 %v827_v51, %v383_v48  ;;  %v300_v61 = vmul.f32 2.0, %v105_v50 }
  0xc6   :  { %v247_v53 = vpop.permute.xlu1 %246  ;;  %v304_v54 = vmul.f32 2.0, %v117_v52 }
  0xc7   :  { %vm265_vm15 = vcmp.eq.s32.totalorder %v247_v53, %v764_v13  ;;  %v316_v6 = vsub.f32 %v754_v63, %v300_v61 }
  0xc8   :  { %v833_v57 = vsel %vm265_vm15, 1.0, %v593_v55  ;;  %v320_v58 = vsub.f32 %v762_v10, %v304_v54 }
  0xc9   :  { %v385_v59 = vadd.f32 %v833_v57, %v384_v56  ;;  %v332_v55 = vmul.f32 %v769_v16, %v316_v6 }
  0xca   :  { %v336_v0 = vmul.f32 %v459_v26, %v320_v58  ;;  %v371_v26 = vld [vmem:[#allocation3] sm:$0x1] }
  0xcb   :  { %v386_v2 = vadd.f32 %v838_v60, %v385_v59  ;;  %v129_v29 = vpop.f32.mrf.mxu2 }
  0xcc   :  { %v108_v5 = vpop.f32.mrf.mxu0  ;;  %v141_v42 = vpop.f32.mrf.mxu3 }
  0xcd   :  { %v387_v3 = vrot.slane %v386_v2, 4  ;;  %v301_v8 = vmul.f32 2.0, %v108_v5  ;;  %v120_v9 = vpop.f32.mrf.mxu1 }
  0xce   :  { %v305_v12 = vmul.f32 2.0, %v120_v9 }
  0xcf   :  { %v388_v11 = vadd.f32 %v387_v3, %v386_v2  ;;  %v317_v14 = vsub.f32 %v756_v1, %v301_v8 }
  0xd0   :  { %v321_v15 = vsub.f32 %v758_v4, %v305_v12 }
  0xd1   :  { %v389_v10 = vrot.slane %v388_v11, 2  ;;  %v333_v18 = vmul.f32 %v772_v17, %v317_v14 }
  0xd2   :  { %v337_v21 = vmul.f32 %v460_v28, %v321_v15 }
  0xd3   :  { %v390_v19 = vadd.f32 %v389_v10, %v388_v11  ;;  %v348_v22 = vadd.f32 %v333_v18, %v332_v55  ;;  %v132_v34 = vpop.f32.mrf.mxu2 }
  0xd4   :  { %v111_v25 = vpop.f32.mrf.mxu0  ;;  %v144_v54 = vpop.f32.mrf.mxu3  ;;  %v309_v56 = vmul.f32 2.0, %v132_v34 }
  0xd5   :  { %v391_v23 = vrot.slane %v390_v19, 1  ;;  %v302_v63 = vmul.f32 2.0, %v111_v25  ;;  %v123_v28 = vpop.f32.mrf.mxu1 }
  0xd6   :  { %v306_v40 = vmul.f32 2.0, %v123_v28 }
  0xd7   :  { %v392_v27 = vadd.f32 %v391_v23, %v390_v19  ;;  %v318_v30 = vsub.f32 %v752_v62, %v302_v63  ;;  %v312_v23 = vmul.f32 2.0, %v141_v42 }
  0xd9   :  { %v393_v32 = vadd.f32 %v392_v27, %v371_v26  ;;  %v334_v1 = vmul.f32 %v778_v20, %v318_v30 }
  0xdb   :  { %394 = vst [vmem:[#allocation3] sm:$0x1] %v393_v32  ;;  %v349_v4 = vadd.f32 %v348_v22, %v334_v1  ;;  %v135_v48 = vpop.f32.mrf.mxu2 }
  0xdc   :  { %v114_v33 = vpop.f32.mrf.mxu0  ;;  %v147_v15 = vpop.f32.mrf.mxu3 }
  0xdd   :  { %v303_v16 = vmul.f32 2.0, %v114_v33  ;;  %v126_v49 = vpop.f32.mrf.mxu1 }
  0xde   :  { %v307_v52 = vmul.f32 2.0, %v126_v49  ;;  %v299_v49 = vld [vmem:[#allocation2] sm:$0x1] }
  0xdf   :  { %v319_v17 = vsub.f32 %v760_v7, %v303_v16  ;;  %v308_v7 = vmul.f32 2.0, %v129_v29 }
  0xe1   :  { %v335_v36 = vmul.f32 %v784_v24, %v319_v17 }
  0xe2   :  { %v398_v29 = vld [vmem:[#allocation3] sm:$0x1] }
  0xe3   :  { %v350_v38 = vadd.f32 %v349_v4, %v335_v36  ;;  %v138_v2 = vpop.f32.mrf.mxu2  ;;  %v314_v4 = vmul.f32 2.0, %v147_v15 }
  0xe4   :  { %v188_v58 = vpop.xlane.xlu0 %187  ;;  %v150_v30 = vpop.f32.mrf.mxu3 }
  0xe5   :  { %v351_v43 = vadd.f32 %v350_v38, %v336_v0  ;;  %v325_v3 = vsub.f32 %v188_v58, %v309_v56  ;;  %v310_v0 = vmul.f32 2.0, %v135_v48  ;;  %v315_v16 = vmul.f32 2.0, %v150_v30 }
  0xe6   :  { %v182_v45 = vpop.xlane.xlu2 %181 }
  0xe7   :  { %v322_v46 = vsub.f32 %v182_v45, %v306_v40  ;;  %v352_v62 = vadd.f32 %v351_v43, %v337_v21  ;;  %v341_v11 = vmul.f32 %v808_v39, %v325_v3 }
  0xe9   :  { %v338_v20 = vmul.f32 %v792_v31, %v322_v46  ;;  %v311_v31 = vmul.f32 2.0, %v138_v2 }
  0xeb   :  { %v353_v50 = vadd.f32 %v352_v62, %v338_v20 }
  0xee   :  { %v186_v53 = vpop.xlane.xlu2 %185 }
  0xef   :  { %v324_v24 = vsub.f32 %v186_v53, %v308_v7 }
  0xf1   :  { %v184_v59 = vpop.xlane.xlu1 %183  ;;  %v340_v6 = vmul.f32 %v803_v37, %v324_v24  ;;  %v313_v37 = vmul.f32 2.0, %v144_v54 }
  0xf2   :  { %v323_v61 = vsub.f32 %v184_v59, %v307_v52 }
  0xf4   :  { %v339_v5 = vmul.f32 %v798_v35, %v323_v61 }
  0xf6   :  { %v354_v8 = vadd.f32 %v353_v50, %v339_v5  ;;  %v190_v9 = vpop.xlane.xlu2 %189  ;;  %v594_v5 = vmov 10.0  }
  0xf7   :  { %v326_v14 = vsub.f32 %v190_v9, %v310_v0 }
  0xf8   :  { %v355_v12 = vadd.f32 %v354_v8, %v340_v6 }
  0xf9   :  { %v192_v10 = vpop.xlane.xlu1 %191  ;;  %v342_v55 = vmul.f32 %v813_v41, %v326_v14  ;;  %v403_v41 = vadd.f32 1e-10, %v398_v29 }
  0xfa   :  { %v356_v18 = vadd.f32 %v355_v12, %v341_v11  ;;  %v327_v19 = vsub.f32 %v192_v10, %v311_v31 }
  0xfb   :  { %533 = vrcp.f32 %v403_v41 }
  0xfc   :  { %v357_v21 = vadd.f32 %v356_v18, %v342_v55  ;;  %v343_v22 = vmul.f32 %v818_v44, %v327_v19  ;;  %535 = vrcp.f32 %v594_v5 }
  0xfe   :  { %v358_v35 = vadd.f32 %v357_v21, %v343_v22  ;;  %v194_v25 = vpop.xlane.xlu2 %193 }
  0xff   :  { %v328_v26 = vsub.f32 %v194_v25, %v312_v23 }
 0x101   :  { %v196_v63 = vpop.xlane.xlu1 %195  ;;  %v344_v27 = vmul.f32 %v822_v47, %v328_v26  ;;  %v534_v42 = vpop.eup %533 }
 0x102   :  { %v329_v39 = vsub.f32 %v196_v63, %v313_v37  ;;  %v405_v46 = vmul.f32 %v534_v42, %v403_v41  ;;  %v536_v6 = vpop.eup %535 }
 0x103   :  { %v359_v32 = vadd.f32 %v358_v35, %v344_v27  ;;  %v428_v8 = vmul.f32 10.0, %v536_v6  ;;  %vm432_vm2 = vweird.f32 %v536_v6 }
 0x104   :  { %v345_v1 = vmul.f32 %v827_v51, %v329_v39  ;;  %v406_v48 = vsub.f32 2.0, %v405_v46 }
 0x105   :  { %v429_v31 = vsub.f32 1.0, %v428_v8 }
 0x106   :  { %v360_v33 = vadd.f32 %v359_v32, %v345_v1  ;;  %v198_v17 = vpop.xlane.xlu2 %197  ;;  %v407_v52 = vmul.f32 %v534_v42, %v406_v48 }
 0x107   :  { %v330_v44 = vsub.f32 %v198_v17, %v314_v4  ;;  %v430_v14 = vmul.f32 %v536_v6, %v429_v31 }
 0x108   :  { %v408_v54 = vmul.f32 %v407_v52, %v403_v41 }
 0x109   :  { %v200_v34 = vpop.xlane.xlu1 %199  ;;  %v346_v28 = vmul.f32 %v833_v57, %v330_v44  ;;  %v400_v57 = vld [vmem:[%s870_s3] sm:$0x1]  ;;  %v431_v55 = vadd.f32 %v536_v6, %v430_v14  ;;  %s595_s3 = smov [#allocation7]  }
 0x10a   :  { %v331_v36 = vsub.f32 %v200_v34, %v315_v16  ;;  %v401_v7 = vmul.f32 %v400_v57, %v398_v29  ;;  %s443_s5 = sshll.u32 %s595_s3, 4  ;;  %s444_s5 = int_to_ptr.vmem [resolvable:$true] %s443_s5 }
 0x10b   :  { %v361_v38 = vadd.f32 %v360_v33, %v346_v28  ;;  %v433_v19 = vsel %vm432_vm2, %v536_v6, %v431_v55 }
 0x10c   :  { %v347_v47 = vmul.f32 %v838_v60, %v331_v36  ;;  %v409_v60 = vsub.f32 2.0, %v408_v54 }
 0x10e   :  { %v362_v40 = vadd.f32 %v361_v38, %v347_v47  ;;  %v410_v59 = vmul.f32 %v409_v60, %v407_v52 }
 0x110   :  { %v363_v43 = vrot.slane %v362_v40, 4 }
 0x112   :  { %v364_v45 = vadd.f32 %v363_v43, %v362_v40 }
 0x114   :  { %v365_v51 = vrot.slane %v364_v45, 2 }
 0x116   :  { %v366_v62 = vadd.f32 %v365_v51, %v364_v45 }
 0x118   :  { %v367_v20 = vrot.slane %v366_v62, 1 }
 0x11a   :  { %v368_v50 = vadd.f32 %v367_v20, %v366_v62 }
 0x11c   :  { %v369_v53 = vadd.f32 %v368_v50, %v299_v49 }
 0x11e   :  { %370 = vst [vmem:[#allocation2] sm:$0x1] %v369_v53 }
 0x125   :  { %v399_v56 = vld [vmem:[#allocation2] sm:$0x1] }
 0x126   :  { %v402_v58 = vadd.f32 %v401_v7, %v399_v56 }
 0x128   :  { %v411_v24 = vmul.f32 %v410_v59, %v402_v58 }
 0x12a   :  { %v412_v61 = vmax.f32 %v411_v24, 1e-12 }
 0x12c   :  { %v413_v2 = vmin.f32 %v412_v61, 1e+12 }
 0x12e   :  { %v415_v3 = vsel %vm414_vm0, %v413_v2, 0.0 }
 0x12f   :  { %v417_v0 = vsel %vm416_vm1, %v415_v3, 0.0 }
 0x130   :  { %418 = vadd.xlane.f32.xlu2 %v417_v0 }
 0x1a3   :  { %v419_v9 = vpop.xlane.xlu2 %418 }
 0x1a4   :  { %v420_v11 = vrot.slane %v419_v9, 4 }
 0x1a6   :  { %v421_v12 = vadd.f32 %v420_v11, %v419_v9 }
 0x1a8   :  { %v422_v10 = vrot.slane %v421_v12, 2 }
 0x1aa   :  { %v423_v15 = vadd.f32 %v422_v10, %v421_v12 }
 0x1ac   :  { %v424_v18 = vrot.slane %v423_v15, 1 }
 0x1ae   :  { %v425_v13 = vadd.f32 %v424_v18, %v423_v15 }
 0x1b0   :  { %519 = vpush %v425_v13 }
 0x1b1   :  { %521 = vpush %v433_v19 }
 0x1e1   :  { %s520_s6 = spop %519 }
 0x1e2   :  { %s522_s10 = spop %521 }
 0x1e3   :  { %s435_s11 = smul.f32 %s522_s10, %s520_s6 }
 0x1e5   :  { %v436_v21 = vstv %s435_s11 }
 0x1e6   :  { %437 = vst [vmem:[#allocation7] sm:$0x1] %v436_v21 }
 0x1e7   :  { %448 = dma.vmem_to_hbm [thread:$0]  %s444_s5, 16, %s446_s9, [#allocation6]  }
 0x1e8   :  { %587 = dma.done.wait [#allocation6], 16  }
 0x1e9   :  { %588 = vsyncadd [#allocation6], 4294967280 }
 0x1ea   :  { %453 = vsyncpa [#allocation5], 1 }
 0x1eb   :  { %454 = vsyncpa [#allocation6], 1 }

</bundles_post_ra>
